<compile_context>
chip_gen: v7x
topology: tpu7x:2x2x1
jax: 0.10.0
libtpu: 0.0.40
codegen_flags: <defaults>
</compile_context>

<pallas_src>
import functools

import jax
import jax.numpy as jnp
from jax.experimental import pallas as pl
from jax.experimental.pallas import tpu as pltpu


def conv_bn_relu_kernel(x_ref, w_ref, gb_ref, o_ref, *, eps):
    # x_ref:  (Cin, M)   channels-major flattened input (M = N*H*W), caller's dtype
    # w_ref:  (Cout, Cin) caller's dtype
    # gb_ref: (Cout, 2)  f32, column 0 = gamma, column 1 = beta
    # o_ref:  (Cout, M)
    m = x_ref.shape[1]

    # 1x1 conv == pure channel-mixing matmul on the MXU; f32 accumulation.
    y = jnp.dot(w_ref[...], x_ref[...], preferred_element_type=jnp.float32)  # (Cout, M) f32

    # BatchNorm2d training-mode batch statistics over (N, H, W) per channel.
    # Two-pass variance (numerically safe when |mean| >> std), clamped at 0.
    inv_m = jnp.float32(1.0 / m)
    mean = jnp.sum(y, axis=1, keepdims=True) * inv_m          # (Cout, 1)
    centered = y - mean                                       # (Cout, M)
    var = jnp.sum(centered * centered, axis=1, keepdims=True) * inv_m
    var = jnp.maximum(var, 0.0)                               # biased (1/M) variance

    gamma = gb_ref[:, 0:1]                                    # (Cout, 1)
    beta = gb_ref[:, 1:2]                                     # (Cout, 1)
    scale = jax.lax.rsqrt(var + eps) * gamma                  # (Cout, 1)

    # BN affine + ReLU.
    o_ref[...] = jnp.maximum(centered * scale + beta, 0.0).astype(o_ref.dtype)


def conv_bn_relu(x_nchw, weight, gamma, beta, *, eps=1e-3):
    """x_nchw: (N, Cin, H, W); weight: (Cout, Cin, 1, 1); gamma/beta: (Cout,)."""
    N, Cin, H, W = x_nchw.shape
    Cout = weight.shape[0]
    M = N * H * W

    # Channels-major flattening.  For N == 1 this is a free reshape (no data movement).
    if N == 1:
        x2d = x_nchw.reshape(Cin, M)
    else:
        # TODO(synk): for N > 1 fold this layout change into the kernel (3-D BlockSpec over N)
        #             instead of a standalone XLA transpose launch.
        x2d = jnp.transpose(x_nchw, (1, 0, 2, 3)).reshape(Cin, M)

    w2d = weight.reshape(Cout, Cin)
    # Single merged (Cout, 2) scale/shift operand: one DMA instead of two.
    gb = jnp.stack(
        [gamma.astype(jnp.float32), beta.astype(jnp.float32)], axis=1
    )  # (Cout, 2)

    kernel = functools.partial(conv_bn_relu_kernel, eps=eps)

    out_dtype = jnp.float32
    cost = pl.CostEstimate(
        flops=2 * Cout * Cin * M,
        transcendentals=0,
        bytes_accessed=(
            x2d.dtype.itemsize * Cin * M
            + w2d.dtype.itemsize * Cout * Cin
            + 4 * Cout * 2
            + 4 * Cout * M
        ),
    )

    out2d = pl.pallas_call(
        kernel,
        out_shape=jax.ShapeDtypeStruct((Cout, M), out_dtype),
        # Whole-array blocks, single kernel invocation (working set ~1.5 MiB).
        in_specs=[
            pl.BlockSpec((Cin, M), lambda: (0, 0)),
            pl.BlockSpec((Cout, Cin), lambda: (0, 0)),
            pl.BlockSpec((Cout, 2), lambda: (0, 0)),
        ],
        out_specs=pl.BlockSpec((Cout, M), lambda: (0, 0)),
        compiler_params=pltpu.CompilerParams(vmem_limit_bytes=8 << 20),
        cost_estimate=cost,
    )(x2d, w2d, gb)

    # (Cout, M) -> NCHW. Free reshape for N == 1.
    if N == 1:
        return out2d.reshape(N, Cout, H, W)
    return jnp.transpose(out2d.reshape(Cout, N, H, W), (1, 0, 2, 3))


def _reference(x_nchw, weight, gamma, beta, eps=1e-3):
    # Pure-JAX reference mirroring PyTorch training-mode Conv2d(1x1, no bias) + BN + ReLU.
    N, Cin, H, W = x_nchw.shape
    Cout = weight.shape[0]
    x2d = jnp.transpose(x_nchw, (0, 2, 3, 1)).reshape(-1, Cin).astype(jnp.float32)
    y = x2d @ weight.reshape(Cout, Cin).astype(jnp.float32).T
    mean = jnp.mean(y, axis=0, keepdims=True)
    var = jnp.mean((y - mean) ** 2, axis=0, keepdims=True)
    y = (y - mean) / jnp.sqrt(var + eps)
    y = y * gamma.reshape(1, Cout) + beta.reshape(1, Cout)
    y = jnp.maximum(y, 0.0)
    return jnp.transpose(y.reshape(N, H, W, Cout), (0, 3, 1, 2))


if __name__ == "__main__":
    key = jax.random.PRNGKey(0)
    k_x, k_w, k_g, k_b = jax.random.split(key, 4)

    # Shapes implied by the module: input (1, 512, 14, 14), Conv2d(512 -> 112, 1x1).
    N, Cin, H, W = 1, 512, 14, 14
    Cout = 112

    x = jax.random.normal(k_x, (N, Cin, H, W), dtype=jnp.float32)
    weight = jax.random.normal(k_w, (Cout, Cin, 1, 1), dtype=jnp.float32) * 0.05
    gamma = 1.0 + 0.1 * jax.random.normal(k_g, (Cout,), dtype=jnp.float32)
    beta = 0.1 * jax.random.normal(k_b, (Cout,), dtype=jnp.float32)

    out = conv_bn_relu(x, weight, gamma, beta, eps=1e-3)
    out = jax.block_until_ready(out)

    ref = _reference(x, weight, gamma, beta, eps=1e-3)
    assert out.shape == (N, Cout, H, W), out.shape
    assert jnp.allclose(out, ref, atol=1e-4, rtol=1e-4), "mismatch vs reference"

    print("KERNEL_OK")
</pallas_src>

<mosaic_0001>
module attributes {stable_mosaic.version = 11 : i64} {
  func.func @conv_bn_relu_kernel(%arg0: memref<512x196xf32, #tpu.memory_space<vmem>>, %arg1: memref<112x512xf32, #tpu.memory_space<vmem>>, %arg2: memref<112x2xf32, #tpu.memory_space<vmem>>, %arg3: memref<112x196xf32, #tpu.memory_space<vmem>>) attributes {dimension_semantics = [], scalar_prefetch = 0 : i64, scratch_operands = 0 : i64, tpu.core_type = #tpu.core_type<tc>} {
    %c0 = arith.constant 0 : index
    %c0_0 = arith.constant 0 : index
    %0 = vector.load %arg1[%c0, %c0_0] : memref<112x512xf32, #tpu.memory_space<vmem>>, vector<112x512xf32>
    %c0_1 = arith.constant 0 : index
    %c0_2 = arith.constant 0 : index
    %1 = vector.load %arg0[%c0_1, %c0_2] : memref<512x196xf32, #tpu.memory_space<vmem>>, vector<512x196xf32>
    %cst = arith.constant dense<0.000000e+00> : vector<112x196xf32>
    %2 = tpu.matmul %0, %1, %cst {dimension_numbers = #tpu.dot_dimension_numbers<[1], [0], [0], [1], [0, 0, 1, 1], [], []>} : vector<112x512xf32>, vector<512x196xf32>, vector<112x196xf32> -> vector<112x196xf32>
    %cst_3 = arith.constant dense<0.000000e+00> : vector<112xf32>
    %3 = vector.multi_reduction <add>, %2, %cst_3 [1] : vector<112x196xf32> to vector<112xf32>
    %4 = vector.shape_cast %3 : vector<112xf32> to vector<112x1xf32>
    %cst_4 = arith.constant 0.00510204071 : f32
    %5 = vector.broadcast %cst_4 : f32 to vector<112x1xf32>
    %6 = arith.mulf %4, %5 : vector<112x1xf32>
    %7 = vector.broadcast %6 : vector<112x1xf32> to vector<112x196xf32>
    %8 = arith.subf %2, %7 : vector<112x196xf32>
    %9 = arith.mulf %8, %8 : vector<112x196xf32>
    %cst_5 = arith.constant dense<0.000000e+00> : vector<112xf32>
    %10 = vector.multi_reduction <add>, %9, %cst_5 [1] : vector<112x196xf32> to vector<112xf32>
    %11 = vector.shape_cast %10 : vector<112xf32> to vector<112x1xf32>
    %cst_6 = arith.constant 0.00510204071 : f32
    %12 = vector.broadcast %cst_6 : f32 to vector<112x1xf32>
    %13 = arith.mulf %11, %12 : vector<112x1xf32>
    %cst_7 = arith.constant 0.000000e+00 : f32
    %14 = vector.broadcast %cst_7 : f32 to vector<112x1xf32>
    %15 = arith.maximumf %13, %14 : vector<112x1xf32>
    %c0_8 = arith.constant 0 : index
    %c0_9 = arith.constant 0 : index
    %16 = vector.load %arg2[%c0_8, %c0_9] : memref<112x2xf32, #tpu.memory_space<vmem>>, vector<112x1xf32>
    %c0_10 = arith.constant 0 : index
    %c1 = arith.constant 1 : index
    %17 = vector.load %arg2[%c0_10, %c1] : memref<112x2xf32, #tpu.memory_space<vmem>>, vector<112x1xf32>
    %cst_11 = arith.constant 1.000000e-03 : f32
    %18 = vector.broadcast %cst_11 : f32 to vector<112x1xf32>
    %19 = arith.addf %15, %18 : vector<112x1xf32>
    %20 = math.rsqrt %19 : vector<112x1xf32>
    %21 = arith.mulf %20, %16 : vector<112x1xf32>
    %22 = vector.broadcast %21 : vector<112x1xf32> to vector<112x196xf32>
    %23 = arith.mulf %8, %22 : vector<112x196xf32>
    %24 = vector.broadcast %17 : vector<112x1xf32> to vector<112x196xf32>
    %25 = arith.addf %23, %24 : vector<112x196xf32>
    %cst_12 = arith.constant 0.000000e+00 : f32
    %26 = vector.broadcast %cst_12 : f32 to vector<112x196xf32>
    %27 = arith.maximumf %25, %26 : vector<112x196xf32>
    %c0_13 = arith.constant 0 : index
    %c0_14 = arith.constant 0 : index
    %28 = vector.load %arg3[%c0_13, %c0_14] : memref<112x196xf32, #tpu.memory_space<vmem>>, vector<112x196xf32>
    tpu.vector_store %arg3[%c0_13, %c0_14], %27 {strides = array<i32>} : memref<112x196xf32, #tpu.memory_space<vmem>>, vector<112x196xf32>,
    return
  }
}

</mosaic_0001>

<bundles_post_ra>
// kernel: tpu_custom_call.1
= control target key start
LH: loop header
LB: loop body
LE: loop exit
PB: predicated region body
PF: predicated region fallthrough
CT: control target
= control target key end

     0   :  { %vm496_vm0 = vcmask 556032   ;;  %s2269_s0 = inlined_call_operand.vmem [shape: f32[512,196], index: 0, kind: input, shape index: {}]   ;;  %s2270_s1 = inlined_call_operand.vmem [shape: f32[112,512], index: 1, kind: input, shape index: {}]   ;;  %s2271_s2 = inlined_call_operand.vmem [shape: f32[112,2], index: 2, kind: input, shape index: {}]   ;;  %s2272_s3 = inlined_call_operand.vmem [shape: f32[112,196], index: 3, kind: output, shape index: {}]  }
   0x1   :  { %v71_v0 = vld [vmem:[%s2269_s0 + $0x8] sm:$0xff]  ;;  %v73_v1 = vld [vmem:[%s2269_s0 + $0x18] sm:$0xff]  ;;  %v70_v5 = vld [vmem:[%s2269_s0] sm:$0xff] }
   0x2   :  { %v135_v2 = vld [vmem:[%s2269_s0 + $0x208] sm:$0xff]  ;;  %v1019_v3 = vpack.c.bf16 %v73_v1, %v71_v0  ;;  %v137_v4 = vld [vmem:[%s2269_s0 + $0x218] sm:$0xff]  ;;  %v72_v6 = vld [vmem:[%s2269_s0 + $0x10] sm:$0xff] }
   0x3   :  { %v1083_v7 = vpack.c.bf16 %v137_v4, %v135_v2  ;;  %v1021_v8 = vpack.c.bf16 %v72_v6, %v70_v5  ;;  %v134_v9 = vld [vmem:[%s2269_s0 + $0x200] sm:$0xff]  ;;  %v136_v10 = vld [vmem:[%s2269_s0 + $0x210] sm:$0xff]  ;;  %v75_v11 = vld [vmem:[%s2269_s0 + $0x28] sm:$0xff] }
   0x4   :  { %1020 = vmatprep.subr.bf16.mxu1 %v1019_v3  ;;  %v1085_v12 = vpack.c.bf16 %v136_v10, %v134_v9  ;;  %v77_v13 = vld [vmem:[%s2269_s0 + $0x38] sm:$0xff]  ;;  %v139_v14 = vld [vmem:[%s2269_s0 + $0x228] sm:$0xff]  ;;  %v74_v18 = vld [vmem:[%s2269_s0 + $0x20] sm:$0xff] }
   0x5   :  { %v141_v15 = vld [vmem:[%s2269_s0 + $0x238] sm:$0xff]  ;;  %1084 = vmatprep.subr.bf16.mxu0 %v1083_v7  ;;  %1022 = vmatpush1.bf16.msra.mxu1 %v1021_v8  ;;  %v1023_v16 = vpack.c.bf16 %v77_v13, %v75_v11  ;;  %v76_v19 = vld [vmem:[%s2269_s0 + $0x30] sm:$0xff]  ;;  %v138_v20 = vld [vmem:[%s2269_s0 + $0x220] sm:$0xff] }
   0x6   :  { %v1087_v17 = vpack.c.bf16 %v141_v15, %v139_v14  ;;  %1086 = vmatpush1.bf16.msra.mxu0 %v1085_v12  ;;  %v1025_v21 = vpack.c.bf16 %v76_v19, %v74_v18  ;;  %v140_v22 = vld [vmem:[%s2269_s0 + $0x230] sm:$0xff]  ;;  %v79_v23 = vld [vmem:[%s2269_s0 + $0x48] sm:$0xff]  ;;  %v81_v24 = vld [vmem:[%s2269_s0 + $0x58] sm:$0xff] }
   0x7   :  { %1024 = vmatprep.subr.bf16.mxu1 %v1023_v16  ;;  %v1089_v25 = vpack.c.bf16 %v140_v22, %v138_v20  ;;  %v1027_v26 = vpack.c.bf16 %v81_v24, %v79_v23  ;;  %v143_v27 = vld [vmem:[%s2269_s0 + $0x248] sm:$0xff]  ;;  %v145_v28 = vld [vmem:[%s2269_s0 + $0x258] sm:$0xff]  ;;  %v78_v29 = vld [vmem:[%s2269_s0 + $0x40] sm:$0xff] }
   0x8   :  { %1088 = vmatprep.subr.bf16.mxu0 %v1087_v17  ;;  %v1091_v30 = vpack.c.bf16 %v145_v28, %v143_v27  ;;  %v80_v31 = vld [vmem:[%s2269_s0 + $0x50] sm:$0xff]  ;;  %v142_v32 = vld [vmem:[%s2269_s0 + $0x240] sm:$0xff]  ;;  %v83_v35 = vld [vmem:[%s2269_s0 + $0x68] sm:$0xff] }
   0x9   :  { %v144_v33 = vld [vmem:[%s2269_s0 + $0x250] sm:$0xff]  ;;  %1026 = vmatpush1.bf16.msra.mxu1 %v1025_v21  ;;  %v1029_v34 = vpack.c.bf16 %v80_v31, %v78_v29  ;;  %v85_v36 = vld [vmem:[%s2269_s0 + $0x78] sm:$0xff]  ;;  %v147_v37 = vld [vmem:[%s2269_s0 + $0x268] sm:$0xff] }
   0xa   :  { %1090 = vmatpush1.bf16.msra.mxu0 %v1089_v25  ;;  %1028 = vmatprep.subr.bf16.mxu1 %v1027_v26  ;;  %v1093_v38 = vpack.c.bf16 %v144_v33, %v142_v32  ;;  %v1031_v39 = vpack.c.bf16 %v85_v36, %v83_v35  ;;  %v149_v40 = vld [vmem:[%s2269_s0 + $0x278] sm:$0xff]  ;;  %v82_v41 = vld [vmem:[%s2269_s0 + $0x60] sm:$0xff]  ;;  %v84_v42 = vld [vmem:[%s2269_s0 + $0x70] sm:$0xff] }
   0xb   :  { %1092 = vmatprep.subr.bf16.mxu0 %v1091_v30  ;;  %v1095_v43 = vpack.c.bf16 %v149_v40, %v147_v37  ;;  %v146_v44 = vld [vmem:[%s2269_s0 + $0x260] sm:$0xff]  ;;  %v148_v45 = vld [vmem:[%s2269_s0 + $0x270] sm:$0xff]  ;;  %v87_v46 = vld [vmem:[%s2269_s0 + $0x88] sm:$0xff]  ;;  %v1033_v50 = vpack.c.bf16 %v84_v42, %v82_v41 }
   0xc   :  { %v89_v47 = vld [vmem:[%s2269_s0 + $0x98] sm:$0xff]  ;;  %v151_v48 = vld [vmem:[%s2269_s0 + $0x288] sm:$0xff]  ;;  %v1097_v51 = vpack.c.bf16 %v148_v45, %v146_v44  ;;  %v86_v53 = vld [vmem:[%s2269_s0 + $0x80] sm:$0xff] }
   0xd   :  { %v153_v49 = vld [vmem:[%s2269_s0 + $0x298] sm:$0xff]  ;;  %1030 = vmatpush1.bf16.msra.mxu1 %v1029_v34  ;;  %v1035_v52 = vpack.c.bf16 %v89_v47, %v87_v46  ;;  %v88_v54 = vld [vmem:[%s2269_s0 + $0x90] sm:$0xff]  ;;  %v150_v55 = vld [vmem:[%s2269_s0 + $0x280] sm:$0xff] }
   0xe   :  { %1094 = vmatpush1.bf16.msra.mxu0 %v1093_v38  ;;  %1032 = vmatprep.subr.bf16.mxu1 %v1031_v39  ;;  %v1099_v56 = vpack.c.bf16 %v153_v49, %v151_v48  ;;  %v152_v57 = vld [vmem:[%s2269_s0 + $0x290] sm:$0xff]  ;;  %v91_v58 = vld [vmem:[%s2269_s0 + $0xa8] sm:$0xff]  ;;  %v93_v59 = vld [vmem:[%s2269_s0 + $0xb8] sm:$0xff]  ;;  %v1037_v62 = vpack.c.bf16 %v88_v54, %v86_v53 }
   0xf   :  { %1096 = vmatprep.subr.bf16.mxu0 %v1095_v43  ;;  %v155_v60 = vld [vmem:[%s2269_s0 + $0x2a8] sm:$0xff]  ;;  %v157_v61 = vld [vmem:[%s2269_s0 + $0x2b8] sm:$0xff]  ;;  %v1101_v63 = vpack.c.bf16 %v152_v57, %v150_v55  ;;  %v1039_v0 = vpack.c.bf16 %v93_v59, %v91_v58  ;;  %v90_v1 = vld [vmem:[%s2269_s0 + $0xa0] sm:$0xff] }
  0x10   :  { %v92_v2 = vld [vmem:[%s2269_s0 + $0xb0] sm:$0xff]  ;;  %v154_v3 = vld [vmem:[%s2269_s0 + $0x2a0] sm:$0xff]  ;;  %v1103_v4 = vpack.c.bf16 %v157_v61, %v155_v60  ;;  %v95_v6 = vld [vmem:[%s2269_s0 + $0xc8] sm:$0xff] }
  0x11   :  { %1034 = vmatpush1.bf16.msra.mxu1 %v1033_v50  ;;  %v156_v5 = vld [vmem:[%s2269_s0 + $0x2b0] sm:$0xff]  ;;  %v97_v7 = vld [vmem:[%s2269_s0 + $0xd8] sm:$0xff]  ;;  %v159_v8 = vld [vmem:[%s2269_s0 + $0x2c8] sm:$0xff]  ;;  %v1041_v10 = vpack.c.bf16 %v92_v2, %v90_v1 }
  0x12   :  { %1098 = vmatpush1.bf16.msra.mxu0 %v1097_v51  ;;  %1036 = vmatprep.subr.bf16.mxu1 %v1035_v52  ;;  %v161_v9 = vld [vmem:[%s2269_s0 + $0x2d8] sm:$0xff]  ;;  %v1105_v11 = vpack.c.bf16 %v156_v5, %v154_v3  ;;  %v1043_v12 = vpack.c.bf16 %v97_v7, %v95_v6  ;;  %v94_v13 = vld [vmem:[%s2269_s0 + $0xc0] sm:$0xff]  ;;  %v96_v14 = vld [vmem:[%s2269_s0 + $0xd0] sm:$0xff] }
  0x13   :  { %1100 = vmatprep.subr.bf16.mxu0 %v1099_v56  ;;  %v158_v15 = vld [vmem:[%s2269_s0 + $0x2c0] sm:$0xff]  ;;  %v1107_v16 = vpack.c.bf16 %v161_v9, %v159_v8  ;;  %v160_v17 = vld [vmem:[%s2269_s0 + $0x2d0] sm:$0xff]  ;;  %v99_v18 = vld [vmem:[%s2269_s0 + $0xe8] sm:$0xff]  ;;  %v1045_v22 = vpack.c.bf16 %v96_v14, %v94_v13 }
  0x14   :  { %v101_v19 = vld [vmem:[%s2269_s0 + $0xf8] sm:$0xff]  ;;  %v163_v20 = vld [vmem:[%s2269_s0 + $0x2e8] sm:$0xff]  ;;  %v1109_v23 = vpack.c.bf16 %v160_v17, %v158_v15  ;;  %v98_v25 = vld [vmem:[%s2269_s0 + $0xe0] sm:$0xff] }
  0x15   :  { %1038 = vmatpush1.bf16.msra.mxu1 %v1037_v62  ;;  %v165_v21 = vld [vmem:[%s2269_s0 + $0x2f8] sm:$0xff]  ;;  %v1047_v24 = vpack.c.bf16 %v101_v19, %v99_v18  ;;  %v100_v26 = vld [vmem:[%s2269_s0 + $0xf0] sm:$0xff]  ;;  %v162_v27 = vld [vmem:[%s2269_s0 + $0x2e0] sm:$0xff] }
  0x16   :  { %1102 = vmatpush1.bf16.msra.mxu0 %v1101_v63  ;;  %1040 = vmatprep.subr.bf16.mxu1 %v1039_v0  ;;  %v1111_v28 = vpack.c.bf16 %v165_v21, %v163_v20  ;;  %v164_v29 = vld [vmem:[%s2269_s0 + $0x2f0] sm:$0xff]  ;;  %v103_v30 = vld [vmem:[%s2269_s0 + $0x108] sm:$0xff]  ;;  %v105_v31 = vld [vmem:[%s2269_s0 + $0x118] sm:$0xff]  ;;  %v1049_v34 = vpack.c.bf16 %v100_v26, %v98_v25 }
  0x17   :  { %1104 = vmatprep.subr.bf16.mxu0 %v1103_v4  ;;  %v167_v32 = vld [vmem:[%s2269_s0 + $0x308] sm:$0xff]  ;;  %v169_v33 = vld [vmem:[%s2269_s0 + $0x318] sm:$0xff]  ;;  %v1113_v35 = vpack.c.bf16 %v164_v29, %v162_v27  ;;  %v1051_v36 = vpack.c.bf16 %v105_v31, %v103_v30  ;;  %v102_v37 = vld [vmem:[%s2269_s0 + $0x100] sm:$0xff] }
  0x18   :  { %v104_v38 = vld [vmem:[%s2269_s0 + $0x110] sm:$0xff]  ;;  %v166_v39 = vld [vmem:[%s2269_s0 + $0x300] sm:$0xff]  ;;  %v1115_v40 = vpack.c.bf16 %v169_v33, %v167_v32  ;;  %v107_v42 = vld [vmem:[%s2269_s0 + $0x128] sm:$0xff] }
  0x19   :  { %1042 = vmatpush1.bf16.msra.mxu1 %v1041_v10  ;;  %v168_v41 = vld [vmem:[%s2269_s0 + $0x310] sm:$0xff]  ;;  %v109_v43 = vld [vmem:[%s2269_s0 + $0x138] sm:$0xff]  ;;  %v171_v44 = vld [vmem:[%s2269_s0 + $0x328] sm:$0xff]  ;;  %v1053_v46 = vpack.c.bf16 %v104_v38, %v102_v37 }
  0x1a   :  { %1106 = vmatpush1.bf16.msra.mxu0 %v1105_v11  ;;  %1044 = vmatprep.subr.bf16.mxu1 %v1043_v12  ;;  %v173_v45 = vld [vmem:[%s2269_s0 + $0x338] sm:$0xff]  ;;  %v1117_v47 = vpack.c.bf16 %v168_v41, %v166_v39  ;;  %v1055_v48 = vpack.c.bf16 %v109_v43, %v107_v42  ;;  %v106_v49 = vld [vmem:[%s2269_s0 + $0x120] sm:$0xff]  ;;  %v108_v50 = vld [vmem:[%s2269_s0 + $0x130] sm:$0xff] }
  0x1b   :  { %1108 = vmatprep.subr.bf16.mxu0 %v1107_v16  ;;  %v170_v51 = vld [vmem:[%s2269_s0 + $0x320] sm:$0xff]  ;;  %v1119_v52 = vpack.c.bf16 %v173_v45, %v171_v44  ;;  %v172_v53 = vld [vmem:[%s2269_s0 + $0x330] sm:$0xff]  ;;  %v111_v54 = vld [vmem:[%s2269_s0 + $0x148] sm:$0xff]  ;;  %v1057_v58 = vpack.c.bf16 %v108_v50, %v106_v49 }
  0x1c   :  { %v113_v55 = vld [vmem:[%s2269_s0 + $0x158] sm:$0xff]  ;;  %v175_v56 = vld [vmem:[%s2269_s0 + $0x348] sm:$0xff]  ;;  %v1121_v59 = vpack.c.bf16 %v172_v53, %v170_v51  ;;  %v110_v61 = vld [vmem:[%s2269_s0 + $0x140] sm:$0xff] }
  0x1d   :  { %1046 = vmatpush1.bf16.msra.mxu1 %v1045_v22  ;;  %v177_v57 = vld [vmem:[%s2269_s0 + $0x358] sm:$0xff]  ;;  %v1059_v60 = vpack.c.bf16 %v113_v55, %v111_v54  ;;  %v112_v62 = vld [vmem:[%s2269_s0 + $0x150] sm:$0xff]  ;;  %v174_v63 = vld [vmem:[%s2269_s0 + $0x340] sm:$0xff] }
  0x1e   :  { %1110 = vmatpush1.bf16.msra.mxu0 %v1109_v23  ;;  %1048 = vmatprep.subr.bf16.mxu1 %v1047_v24  ;;  %v1123_v0 = vpack.c.bf16 %v177_v57, %v175_v56  ;;  %v176_v1 = vld [vmem:[%s2269_s0 + $0x350] sm:$0xff]  ;;  %v115_v2 = vld [vmem:[%s2269_s0 + $0x168] sm:$0xff]  ;;  %v117_v3 = vld [vmem:[%s2269_s0 + $0x178] sm:$0xff]  ;;  %v1061_v6 = vpack.c.bf16 %v112_v62, %v110_v61 }
  0x1f   :  { %1112 = vmatprep.subr.bf16.mxu0 %v1111_v28  ;;  %v179_v4 = vld [vmem:[%s2269_s0 + $0x368] sm:$0xff]  ;;  %v181_v5 = vld [vmem:[%s2269_s0 + $0x378] sm:$0xff]  ;;  %v114_v7 = vld [vmem:[%s2269_s0 + $0x160] sm:$0xff]  ;;  %v1125_v8 = vpack.c.bf16 %v176_v1, %v174_v63  ;;  %v1063_v9 = vpack.c.bf16 %v117_v3, %v115_v2 }
  0x20   :  { %v116_v10 = vld [vmem:[%s2269_s0 + $0x170] sm:$0xff]  ;;  %v178_v11 = vld [vmem:[%s2269_s0 + $0x360] sm:$0xff]  ;;  %v1127_v13 = vpack.c.bf16 %v181_v5, %v179_v4  ;;  %v119_v14 = vld [vmem:[%s2269_s0 + $0x188] sm:$0xff] }
  0x21   :  { %1050 = vmatpush1.bf16.msra.mxu1 %v1049_v34  ;;  %v180_v12 = vld [vmem:[%s2269_s0 + $0x370] sm:$0xff]  ;;  %v121_v15 = vld [vmem:[%s2269_s0 + $0x198] sm:$0xff]  ;;  %v15_v16 = vld [vmem:[%s2270_s1 + $0x8] sm:$0xff]  ;;  %v1065_v20 = vpack.c.bf16 %v116_v10, %v114_v7 }
  0x22   :  { %1114 = vmatpush1.bf16.msra.mxu0 %v1113_v35  ;;  %1052 = vmatprep.subr.bf16.mxu1 %v1051_v36  ;;  %v183_v17 = vld [vmem:[%s2269_s0 + $0x388] sm:$0xff]  ;;  %v185_v18 = vld [vmem:[%s2269_s0 + $0x398] sm:$0xff]  ;;  %v1129_v21 = vpack.c.bf16 %v180_v12, %v178_v11  ;;  %v1067_v22 = vpack.c.bf16 %v121_v15, %v119_v14  ;;  %v118_v23 = vld [vmem:[%s2269_s0 + $0x180] sm:$0xff] }
  0x23   :  { %1116 = vmatprep.subr.bf16.mxu0 %v1115_v40  ;;  %262 = vmatprep.mubr.f32.mxu1 %v15_v16  ;;  %v17_v19 = vld [vmem:[%s2270_s1 + $0x18] sm:$0xff]  ;;  %v120_v24 = vld [vmem:[%s2269_s0 + $0x190] sm:$0xff]  ;;  %v182_v25 = vld [vmem:[%s2269_s0 + $0x380] sm:$0xff]  ;;  %v1131_v26 = vpack.c.bf16 %v185_v18, %v183_v17 }
  0x24   :  { %411 = vmatprep.mubr.f32.mxu0 %v17_v19  ;;  %v184_v27 = vld [vmem:[%s2269_s0 + $0x390] sm:$0xff]  ;;  %v123_v28 = vld [vmem:[%s2269_s0 + $0x1a8] sm:$0xff]  ;;  %v125_v29 = vld [vmem:[%s2269_s0 + $0x1b8] sm:$0xff]  ;;  %v1069_v32 = vpack.c.bf16 %v120_v24, %v118_v23 }
  0x25   :  { %1054 = vmatpush1.bf16.msra.mxu1 %v1053_v46  ;;  %v187_v30 = vld [vmem:[%s2269_s0 + $0x3a8] sm:$0xff]  ;;  %v189_v31 = vld [vmem:[%s2269_s0 + $0x3b8] sm:$0xff]  ;;  %v1133_v33 = vpack.c.bf16 %v184_v27, %v182_v25  ;;  %v1071_v34 = vpack.c.bf16 %v125_v29, %v123_v28  ;;  %v122_v35 = vld [vmem:[%s2269_s0 + $0x1a0] sm:$0xff] }
  0x26   :  { %1118 = vmatpush1.bf16.msra.mxu0 %v1117_v47  ;;  %1056 = vmatprep.subr.bf16.mxu1 %v1055_v48  ;;  %v124_v36 = vld [vmem:[%s2269_s0 + $0x1b0] sm:$0xff]  ;;  %v186_v37 = vld [vmem:[%s2269_s0 + $0x3a0] sm:$0xff]  ;;  %v1135_v38 = vpack.c.bf16 %v189_v31, %v187_v30  ;;  %v127_v40 = vld [vmem:[%s2269_s0 + $0x1c8] sm:$0xff] }
  0x27   :  { %1120 = vmatprep.subr.bf16.mxu0 %v1119_v52  ;;  %v188_v39 = vld [vmem:[%s2269_s0 + $0x3b0] sm:$0xff]  ;;  %v129_v41 = vld [vmem:[%s2269_s0 + $0x1d8] sm:$0xff]  ;;  %v191_v42 = vld [vmem:[%s2269_s0 + $0x3c8] sm:$0xff]  ;;  %v1073_v44 = vpack.c.bf16 %v124_v36, %v122_v35 }
  0x28   :  { %v193_v43 = vld [vmem:[%s2269_s0 + $0x3d8] sm:$0xff]  ;;  %v1137_v45 = vpack.c.bf16 %v188_v39, %v186_v37  ;;  %v1075_v46 = vpack.c.bf16 %v129_v41, %v127_v40  ;;  %v126_v47 = vld [vmem:[%s2269_s0 + $0x1c0] sm:$0xff]  ;;  %v128_v48 = vld [vmem:[%s2269_s0 + $0x1d0] sm:$0xff] }
  0x29   :  { %1058 = vmatpush1.bf16.msra.mxu1 %v1057_v58  ;;  %v190_v49 = vld [vmem:[%s2269_s0 + $0x3c0] sm:$0xff]  ;;  %v1139_v50 = vpack.c.bf16 %v193_v43, %v191_v42  ;;  %v192_v51 = vld [vmem:[%s2269_s0 + $0x3d0] sm:$0xff]  ;;  %v131_v52 = vld [vmem:[%s2269_s0 + $0x1e8] sm:$0xff]  ;;  %v1077_v56 = vpack.c.bf16 %v128_v48, %v126_v47 }
  0x2a   :  { %1122 = vmatpush1.bf16.msra.mxu0 %v1121_v59  ;;  %1060 = vmatprep.subr.bf16.mxu1 %v1059_v60  ;;  %v133_v53 = vld [vmem:[%s2269_s0 + $0x1f8] sm:$0xff]  ;;  %v195_v54 = vld [vmem:[%s2269_s0 + $0x3e8] sm:$0xff]  ;;  %v1141_v57 = vpack.c.bf16 %v192_v51, %v190_v49  ;;  %v130_v59 = vld [vmem:[%s2269_s0 + $0x1e0] sm:$0xff] }
  0x2b   :  { %1124 = vmatprep.subr.bf16.mxu0 %v1123_v0  ;;  %v197_v55 = vld [vmem:[%s2269_s0 + $0x3f8] sm:$0xff]  ;;  %v1079_v58 = vpack.c.bf16 %v133_v53, %v131_v52  ;;  %v132_v60 = vld [vmem:[%s2269_s0 + $0x1f0] sm:$0xff]  ;;  %v194_v62 = vld [vmem:[%s2269_s0 + $0x3e0] sm:$0xff] }
  0x2c   :  { %v1143_v61 = vpack.c.bf16 %v197_v55, %v195_v54  ;;  %v196_v63 = vld [vmem:[%s2269_s0 + $0x3f0] sm:$0xff]  ;;  %v1081_v0 = vpack.c.bf16 %v132_v60, %v130_v59  ;;  %v14_v2 = vld [vmem:[%s2270_s1] sm:$0xff]  ;;  %v19_v4 = vld [vmem:[%s2270_s1 + $0x28] sm:$0xff] }
  0x2d   :  { %1062 = vmatpush1.bf16.msra.mxu1 %v1061_v6  ;;  %v1145_v1 = vpack.c.bf16 %v196_v63, %v194_v62  ;;  %v16_v3 = vld [vmem:[%s2270_s1 + $0x10] sm:$0xff]  ;;  %v21_v5 = vld [vmem:[%s2270_s1 + $0x38] sm:$0xff]  ;;  %v18_v6 = vld [vmem:[%s2270_s1 + $0x20] sm:$0xff] }
  0x2e   :  { %1126 = vmatpush1.bf16.msra.mxu0 %v1125_v8  ;;  %1064 = vmatprep.subr.bf16.mxu1 %v1063_v9  ;;  %v20_v7 = vld [vmem:[%s2270_s1 + $0x30] sm:$0xff]  ;;  %v23_v8 = vld [vmem:[%s2270_s1 + $0x48] sm:$0xff]  ;;  %v25_v9 = vld [vmem:[%s2270_s1 + $0x58] sm:$0xff] }
  0x2f   :  { %1128 = vmatprep.subr.bf16.mxu0 %v1127_v13  ;;  %v22_v10 = vld [vmem:[%s2270_s1 + $0x40] sm:$0xff]  ;;  %v24_v11 = vld [vmem:[%s2270_s1 + $0x50] sm:$0xff]  ;;  %v27_v12 = vld [vmem:[%s2270_s1 + $0x68] sm:$0xff] }
  0x30   :  { %v29_v13 = vld [vmem:[%s2270_s1 + $0x78] sm:$0xff]  ;;  %v26_v14 = vld [vmem:[%s2270_s1 + $0x60] sm:$0xff]  ;;  %v28_v15 = vld [vmem:[%s2270_s1 + $0x70] sm:$0xff] }
  0x31   :  { %1066 = vmatpush1.bf16.msra.mxu1 %v1065_v20  ;;  %v31_v16 = vld [vmem:[%s2270_s1 + $0x88] sm:$0xff]  ;;  %v33_v17 = vld [vmem:[%s2270_s1 + $0x98] sm:$0xff]  ;;  %v30_v18 = vld [vmem:[%s2270_s1 + $0x80] sm:$0xff] }
  0x32   :  { %1130 = vmatpush1.bf16.msra.mxu0 %v1129_v21  ;;  %1068 = vmatprep.subr.bf16.mxu1 %v1067_v22  ;;  %v32_v19 = vld [vmem:[%s2270_s1 + $0x90] sm:$0xff]  ;;  %v35_v20 = vld [vmem:[%s2270_s1 + $0xa8] sm:$0xff]  ;;  %v37_v21 = vld [vmem:[%s2270_s1 + $0xb8] sm:$0xff] }
  0x33   :  { %1132 = vmatprep.subr.bf16.mxu0 %v1131_v26  ;;  %v34_v22 = vld [vmem:[%s2270_s1 + $0xa0] sm:$0xff]  ;;  %v36_v23 = vld [vmem:[%s2270_s1 + $0xb0] sm:$0xff]  ;;  %v39_v24 = vld [vmem:[%s2270_s1 + $0xc8] sm:$0xff] }
  0x34   :  { %v41_v25 = vld [vmem:[%s2270_s1 + $0xd8] sm:$0xff]  ;;  %v38_v26 = vld [vmem:[%s2270_s1 + $0xc0] sm:$0xff]  ;;  %v40_v27 = vld [vmem:[%s2270_s1 + $0xd0] sm:$0xff] }
  0x35   :  { %1070 = vmatpush1.bf16.msra.mxu1 %v1069_v32  ;;  %v43_v28 = vld [vmem:[%s2270_s1 + $0xe8] sm:$0xff]  ;;  %v45_v29 = vld [vmem:[%s2270_s1 + $0xf8] sm:$0xff]  ;;  %v42_v30 = vld [vmem:[%s2270_s1 + $0xe0] sm:$0xff] }
  0x36   :  { %1134 = vmatpush1.bf16.msra.mxu0 %v1133_v33  ;;  %1072 = vmatprep.subr.bf16.mxu1 %v1071_v34  ;;  %v44_v31 = vld [vmem:[%s2270_s1 + $0xf0] sm:$0xff]  ;;  %v47_v32 = vld [vmem:[%s2270_s1 + $0x108] sm:$0xff]  ;;  %v49_v33 = vld [vmem:[%s2270_s1 + $0x118] sm:$0xff] }
  0x37   :  { %1136 = vmatprep.subr.bf16.mxu0 %v1135_v38  ;;  %v46_v34 = vld [vmem:[%s2270_s1 + $0x100] sm:$0xff]  ;;  %v48_v35 = vld [vmem:[%s2270_s1 + $0x110] sm:$0xff]  ;;  %v51_v36 = vld [vmem:[%s2270_s1 + $0x128] sm:$0xff] }
  0x38   :  { %v53_v37 = vld [vmem:[%s2270_s1 + $0x138] sm:$0xff]  ;;  %v50_v38 = vld [vmem:[%s2270_s1 + $0x120] sm:$0xff]  ;;  %v52_v39 = vld [vmem:[%s2270_s1 + $0x130] sm:$0xff] }
  0x39   :  { %1074 = vmatpush1.bf16.msra.mxu1 %v1073_v44  ;;  %v55_v40 = vld [vmem:[%s2270_s1 + $0x148] sm:$0xff]  ;;  %v57_v41 = vld [vmem:[%s2270_s1 + $0x158] sm:$0xff]  ;;  %v54_v42 = vld [vmem:[%s2270_s1 + $0x140] sm:$0xff] }
  0x3a   :  { %1138 = vmatpush1.bf16.msra.mxu0 %v1137_v45  ;;  %1076 = vmatprep.subr.bf16.mxu1 %v1075_v46  ;;  %v56_v43 = vld [vmem:[%s2270_s1 + $0x150] sm:$0xff]  ;;  %v59_v44 = vld [vmem:[%s2270_s1 + $0x168] sm:$0xff]  ;;  %v61_v45 = vld [vmem:[%s2270_s1 + $0x178] sm:$0xff] }
  0x3b   :  { %1140 = vmatprep.subr.bf16.mxu0 %v1139_v50  ;;  %v58_v46 = vld [vmem:[%s2270_s1 + $0x160] sm:$0xff]  ;;  %v60_v47 = vld [vmem:[%s2270_s1 + $0x170] sm:$0xff]  ;;  %v63_v48 = vld [vmem:[%s2270_s1 + $0x188] sm:$0xff] }
  0x3c   :  { %v65_v49 = vld [vmem:[%s2270_s1 + $0x198] sm:$0xff]  ;;  %v62_v50 = vld [vmem:[%s2270_s1 + $0x180] sm:$0xff]  ;;  %v64_v51 = vld [vmem:[%s2270_s1 + $0x190] sm:$0xff] }
  0x3d   :  { %1078 = vmatpush1.bf16.msra.mxu1 %v1077_v56  ;;  %v67_v52 = vld [vmem:[%s2270_s1 + $0x1a8] sm:$0xff]  ;;  %v69_v53 = vld [vmem:[%s2270_s1 + $0x1b8] sm:$0xff]  ;;  %v66_v54 = vld [vmem:[%s2270_s1 + $0x1a0] sm:$0xff] }
  0x3e   :  { %1142 = vmatpush1.bf16.msra.mxu0 %v1141_v57  ;;  %1080 = vmatprep.subr.bf16.mxu1 %v1079_v58  ;;  %v68_v55 = vld [vmem:[%s2270_s1 + $0x1b0] sm:$0xff] }
  0x3f   :  { %1144 = vmatprep.subr.bf16.mxu0 %v1143_v61 }
  0x41   :  { %1082 = vmatpush1.bf16.msra.mxu1 %v1081_v0 }
  0x42   :  { %1146 = vmatpush1.bf16.msra.mxu0 %v1145_v1 }
  0x44   :  { %263 = vmatmul.mubr.f32.vlgmr.msra.gmra.mrb[0].mxu1 %v14_v2 }
  0x45   :  { %412 = vmatmul.mubr.f32.vlgmr.msra.gmra.mrb[0].mxu0 %v16_v3  ;;  %268 = vmatprep.mubr.f32.mxu1 %v19_v4 }
  0x46   :  { %417 = vmatprep.mubr.f32.mxu0 %v21_v5 }
  0x48   :  { %269 = vmatmul.mubr.f32.gmra.mrb[2].mxu1 %v18_v6 }
  0x49   :  { %418 = vmatmul.mubr.f32.gmra.mrb[2].mxu0 %v20_v7  ;;  %274 = vmatprep.mubr.f32.mxu1 %v23_v8 }
  0x4a   :  { %423 = vmatprep.mubr.f32.mxu0 %v25_v9 }
  0x4c   :  { %275 = vmatmul.mubr.f32.gmra.mrb[4].mxu1 %v22_v10 }
  0x4d   :  { %424 = vmatmul.mubr.f32.gmra.mrb[4].mxu0 %v24_v11  ;;  %280 = vmatprep.mubr.f32.mxu1 %v27_v12 }
  0x4e   :  { %429 = vmatprep.mubr.f32.mxu0 %v29_v13 }
  0x50   :  { %281 = vmatmul.mubr.f32.gmra.mrb[6].mxu1 %v26_v14 }
  0x51   :  { %430 = vmatmul.mubr.f32.gmra.mrb[6].mxu0 %v28_v15  ;;  %286 = vmatprep.mubr.f32.mxu1 %v31_v16 }
  0x52   :  { %435 = vmatprep.mubr.f32.mxu0 %v33_v17 }
  0x54   :  { %287 = vmatmul.mubr.f32.gmra.mrb[8].mxu1 %v30_v18 }
  0x55   :  { %436 = vmatmul.mubr.f32.gmra.mrb[8].mxu0 %v32_v19  ;;  %292 = vmatprep.mubr.f32.mxu1 %v35_v20 }
  0x56   :  { %441 = vmatprep.mubr.f32.mxu0 %v37_v21 }
  0x58   :  { %293 = vmatmul.mubr.f32.gmra.mrb[10].mxu1 %v34_v22 }
  0x59   :  { %442 = vmatmul.mubr.f32.gmra.mrb[10].mxu0 %v36_v23  ;;  %298 = vmatprep.mubr.f32.mxu1 %v39_v24 }
  0x5a   :  { %447 = vmatprep.mubr.f32.mxu0 %v41_v25 }
  0x5c   :  { %299 = vmatmul.mubr.f32.gmra.mrb[12].mxu1 %v38_v26 }
  0x5d   :  { %448 = vmatmul.mubr.f32.gmra.mrb[12].mxu0 %v40_v27  ;;  %304 = vmatprep.mubr.f32.mxu1 %v43_v28 }
  0x5e   :  { %453 = vmatprep.mubr.f32.mxu0 %v45_v29 }
  0x60   :  { %305 = vmatmul.mubr.f32.gmra.mrb[14].mxu1 %v42_v30 }
  0x61   :  { %454 = vmatmul.mubr.f32.gmra.mrb[14].mxu0 %v44_v31  ;;  %310 = vmatprep.mubr.f32.mxu1 %v47_v32 }
  0x62   :  { %459 = vmatprep.mubr.f32.mxu0 %v49_v33 }
  0x64   :  { %311 = vmatmul.mubr.f32.gmra.mrb[16].mxu1 %v46_v34 }
  0x65   :  { %460 = vmatmul.mubr.f32.gmra.mrb[16].mxu0 %v48_v35  ;;  %316 = vmatprep.mubr.f32.mxu1 %v51_v36 }
  0x66   :  { %465 = vmatprep.mubr.f32.mxu0 %v53_v37 }
  0x68   :  { %317 = vmatmul.mubr.f32.gmra.mrb[18].mxu1 %v50_v38 }
  0x69   :  { %466 = vmatmul.mubr.f32.gmra.mrb[18].mxu0 %v52_v39  ;;  %322 = vmatprep.mubr.f32.mxu1 %v55_v40 }
  0x6a   :  { %471 = vmatprep.mubr.f32.mxu0 %v57_v41 }
  0x6c   :  { %323 = vmatmul.mubr.f32.gmra.mrb[20].mxu1 %v54_v42 }
  0x6d   :  { %472 = vmatmul.mubr.f32.gmra.mrb[20].mxu0 %v56_v43  ;;  %328 = vmatprep.mubr.f32.mxu1 %v59_v44 }
  0x6e   :  { %477 = vmatprep.mubr.f32.mxu0 %v61_v45 }
  0x70   :  { %329 = vmatmul.mubr.f32.gmra.mrb[22].mxu1 %v58_v46 }
  0x71   :  { %478 = vmatmul.mubr.f32.gmra.mrb[22].mxu0 %v60_v47  ;;  %334 = vmatprep.mubr.f32.mxu1 %v63_v48 }
  0x72   :  { %483 = vmatprep.mubr.f32.mxu0 %v65_v49 }
  0x74   :  { %335 = vmatmul.mubr.f32.gmra.mrb[24].mxu1 %v62_v50 }
  0x75   :  { %484 = vmatmul.mubr.f32.gmra.mrb[24].mxu0 %v64_v51  ;;  %340 = vmatprep.mubr.f32.mxu1 %v67_v52 }
  0x76   :  { %489 = vmatprep.mubr.f32.mxu0 %v69_v53 }
  0x78   :  { %341 = vmatmul.mubr.f32.gmra.mrb[26].mxu1 %v66_v54 }
  0x79   :  { %490 = vmatmul.mubr.f32.gmra.mrb[26].mxu0 %v68_v55 }
 0x117   :  { %v264_v56 = vpop.f32.mrb[0].mxu1 }
 0x118   :  { %v413_v57 = vpop.f32.mrb[0].mxu0  ;;  %v266_v58 = vpop.f32.mrb[1].mxu1 }
 0x119   :  { %v1785_v59 = vadd.f32 %v413_v57, %v264_v56  ;;  %v415_v60 = vpop.f32.mrb[1].mxu0 }
 0x11a   :  { %v1787_v61 = vadd.f32 %v415_v60, %v266_v58 }
 0x11b   :  { %v270_v62 = vpop.f32.mrb[2].mxu1 }
 0x11c   :  { %v419_v63 = vpop.f32.mrb[2].mxu0  ;;  %v272_v0 = vpop.f32.mrb[3].mxu1  ;;  %v497_v1 = vsel %vm496_vm0, %v1787_v61, 0.0 }
 0x11d   :  { %v1791_v2 = vadd.f32 %v419_v63, %v270_v62  ;;  %v421_v3 = vpop.f32.mrb[3].mxu0  ;;  %v498_v4 = vadd.f32 %v497_v1, %v1785_v59 }
 0x11e   :  { %v1794_v5 = vadd.f32 %v421_v3, %v272_v0 }
 0x11f   :  { %499 = vadd.xlane.f32.xlu0 %v498_v4  ;;  %v276_v6 = vpop.f32.mrb[4].mxu1 }
 0x120   :  { %v425_v7 = vpop.f32.mrb[4].mxu0  ;;  %v278_v8 = vpop.f32.mrb[5].mxu1  ;;  %v501_v9 = vsel %vm496_vm0, %v1794_v5, 0.0 }
 0x121   :  { %v1798_v10 = vadd.f32 %v425_v7, %v276_v6  ;;  %v427_v11 = vpop.f32.mrb[5].mxu0  ;;  %v502_v12 = vadd.f32 %v501_v9, %v1791_v2 }
 0x122   :  { %v1801_v13 = vadd.f32 %v427_v11, %v278_v8 }
 0x123   :  { %503 = vadd.xlane.f32.xlu0 %v502_v12  ;;  %v282_v14 = vpop.f32.mrb[6].mxu1 }
 0x124   :  { %v431_v15 = vpop.f32.mrb[6].mxu0  ;;  %v284_v16 = vpop.f32.mrb[7].mxu1  ;;  %v505_v17 = vsel %vm496_vm0, %v1801_v13, 0.0 }
 0x125   :  { %v1805_v18 = vadd.f32 %v431_v15, %v282_v14  ;;  %v433_v19 = vpop.f32.mrb[7].mxu0  ;;  %v506_v20 = vadd.f32 %v505_v17, %v1798_v10 }
 0x126   :  { %v1808_v21 = vadd.f32 %v433_v19, %v284_v16 }
 0x127   :  { %507 = vadd.xlane.f32.xlu1 %v506_v20  ;;  %v288_v22 = vpop.f32.mrb[8].mxu1 }
 0x128   :  { %v437_v23 = vpop.f32.mrb[8].mxu0  ;;  %v290_v24 = vpop.f32.mrb[9].mxu1  ;;  %v509_v25 = vsel %vm496_vm0, %v1808_v21, 0.0 }
 0x129   :  { %v1812_v26 = vadd.f32 %v437_v23, %v288_v22  ;;  %v439_v27 = vpop.f32.mrb[9].mxu0  ;;  %v510_v28 = vadd.f32 %v509_v25, %v1805_v18 }
 0x12a   :  { %v1815_v29 = vadd.f32 %v439_v27, %v290_v24 }
 0x12b   :  { %511 = vadd.xlane.f32.xlu1 %v510_v28  ;;  %v294_v30 = vpop.f32.mrb[10].mxu1 }
 0x12c   :  { %v443_v31 = vpop.f32.mrb[10].mxu0  ;;  %v296_v32 = vpop.f32.mrb[11].mxu1  ;;  %v513_v33 = vsel %vm496_vm0, %v1815_v29, 0.0 }
 0x12d   :  { %v1819_v34 = vadd.f32 %v443_v31, %v294_v30  ;;  %v445_v35 = vpop.f32.mrb[11].mxu0  ;;  %v514_v36 = vadd.f32 %v513_v33, %v1812_v26 }
 0x12e   :  { %v1822_v37 = vadd.f32 %v445_v35, %v296_v32 }
 0x12f   :  { %515 = vadd.xlane.f32.xlu0 %v514_v36  ;;  %v300_v38 = vpop.f32.mrb[12].mxu1 }
 0x130   :  { %v449_v39 = vpop.f32.mrb[12].mxu0  ;;  %v302_v40 = vpop.f32.mrb[13].mxu1  ;;  %v517_v41 = vsel %vm496_vm0, %v1822_v37, 0.0 }
 0x131   :  { %v1826_v42 = vadd.f32 %v449_v39, %v300_v38  ;;  %v451_v43 = vpop.f32.mrb[13].mxu0  ;;  %v518_v44 = vadd.f32 %v517_v41, %v1819_v34 }
 0x132   :  { %v1829_v45 = vadd.f32 %v451_v43, %v302_v40 }
 0x133   :  { %519 = vadd.xlane.f32.xlu1 %v518_v44  ;;  %v306_v46 = vpop.f32.mrb[14].mxu1 }
 0x134   :  { %v455_v47 = vpop.f32.mrb[14].mxu0  ;;  %v308_v48 = vpop.f32.mrb[15].mxu1  ;;  %v521_v49 = vsel %vm496_vm0, %v1829_v45, 0.0 }
 0x135   :  { %v1833_v50 = vadd.f32 %v455_v47, %v306_v46  ;;  %v457_v51 = vpop.f32.mrb[15].mxu0  ;;  %v522_v52 = vadd.f32 %v521_v49, %v1826_v42 }
 0x136   :  { %v1836_v53 = vadd.f32 %v457_v51, %v308_v48 }
 0x137   :  { %523 = vadd.xlane.f32.xlu0 %v522_v52  ;;  %v312_v54 = vpop.f32.mrb[16].mxu1 }
 0x138   :  { %v461_v55 = vpop.f32.mrb[16].mxu0  ;;  %v314_v56 = vpop.f32.mrb[17].mxu1  ;;  %v525_v57 = vsel %vm496_vm0, %v1836_v53, 0.0 }
 0x139   :  { %v1840_v58 = vadd.f32 %v461_v55, %v312_v54  ;;  %v463_v60 = vpop.f32.mrb[17].mxu0  ;;  %v526_v62 = vadd.f32 %v525_v57, %v1833_v50 }
 0x13a   :  { %v1843_v63 = vadd.f32 %v463_v60, %v314_v56  ;;  %v1211_v56 = vmov 1  }
 0x13b   :  { %527 = vadd.xlane.f32.xlu1 %v526_v62  ;;  %v318_v0 = vpop.f32.mrb[18].mxu1  ;;  %1178 = vset.pattern.permute.xlu0 %v1211_v56 }
 0x13c   :  { %v467_v1 = vpop.f32.mrb[18].mxu0  ;;  %v320_v3 = vpop.f32.mrb[19].mxu1  ;;  %v529_v4 = vsel %vm496_vm0, %v1843_v63, 0.0  ;;  %1177 = vset.pattern.permute.xlu1 %v1211_v56 }
 0x13d   :  { %v1847_v6 = vadd.f32 %v467_v1, %v318_v0  ;;  %v469_v7 = vpop.f32.mrb[19].mxu0  ;;  %v530_v8 = vadd.f32 %v529_v4, %v1840_v58 }
 0x13e   :  { %v1850_v9 = vadd.f32 %v469_v7, %v320_v3 }
 0x13f   :  { %531 = vadd.xlane.f32.xlu0 %v530_v8  ;;  %v324_v11 = vpop.f32.mrb[20].mxu1 }
 0x140   :  { %v473_v12 = vpop.f32.mrb[20].mxu0  ;;  %v326_v14 = vpop.f32.mrb[21].mxu1  ;;  %v533_v15 = vsel %vm496_vm0, %v1850_v9, 0.0 }
 0x141   :  { %v1854_v16 = vadd.f32 %v473_v12, %v324_v11  ;;  %v475_v17 = vpop.f32.mrb[21].mxu0  ;;  %v534_v19 = vadd.f32 %v533_v15, %v1847_v6 }
 0x142   :  { %v1857_v20 = vadd.f32 %v475_v17, %v326_v14 }
 0x143   :  { %535 = vadd.xlane.f32.xlu1 %v534_v19  ;;  %v330_v22 = vpop.f32.mrb[22].mxu1 }
 0x144   :  { %v479_v23 = vpop.f32.mrb[22].mxu0  ;;  %v332_v24 = vpop.f32.mrb[23].mxu1  ;;  %v537_v25 = vsel %vm496_vm0, %v1857_v20, 0.0 }
 0x145   :  { %v1861_v27 = vadd.f32 %v479_v23, %v330_v22  ;;  %v481_v28 = vpop.f32.mrb[23].mxu0  ;;  %v538_v30 = vadd.f32 %v537_v25, %v1854_v16 }
 0x146   :  { %v1864_v31 = vadd.f32 %v481_v28, %v332_v24 }
 0x147   :  { %539 = vadd.xlane.f32.xlu0 %v538_v30  ;;  %v336_v32 = vpop.f32.mrb[24].mxu1 }
 0x148   :  { %v485_v33 = vpop.f32.mrb[24].mxu0  ;;  %v338_v35 = vpop.f32.mrb[25].mxu1  ;;  %v541_v36 = vsel %vm496_vm0, %v1864_v31, 0.0 }
 0x149   :  { %v1868_v38 = vadd.f32 %v485_v33, %v336_v32  ;;  %v487_v39 = vpop.f32.mrb[25].mxu0  ;;  %v542_v40 = vadd.f32 %v541_v36, %v1861_v27 }
 0x14a   :  { %v1871_v41 = vadd.f32 %v487_v39, %v338_v35 }
 0x14b   :  { %543 = vadd.xlane.f32.xlu1 %v542_v40  ;;  %v342_v43 = vpop.f32.mrb[26].mxu1 }
 0x14c   :  { %v491_v44 = vpop.f32.mrb[26].mxu0  ;;  %v344_v46 = vpop.f32.mrb[27].mxu1  ;;  %v545_v47 = vsel %vm496_vm0, %v1871_v41, 0.0 }
 0x14d   :  { %v1875_v48 = vadd.f32 %v491_v44, %v342_v43  ;;  %v493_v49 = vpop.f32.mrb[27].mxu0  ;;  %v546_v51 = vadd.f32 %v545_v47, %v1868_v38 }
 0x14e   :  { %v1878_v52 = vadd.f32 %v493_v49, %v344_v46 }
 0x14f   :  { %547 = vadd.xlane.f32.xlu0 %v546_v51 }
 0x150   :  { %v549_v54 = vsel %vm496_vm0, %v1878_v52, 0.0 }
 0x151   :  { %v550_v55 = vadd.f32 %v549_v54, %v1875_v48 }
 0x153   :  { %551 = vadd.xlane.f32.xlu1 %v550_v55 }
 0x1ac   :  { %v500_v57 = vpop.xlane.xlu0 %499 }
 0x1ad   :  { %v553_v60 = vmul.f32 0.0051020407, %v500_v57 }
 0x1af   :  { %v1886_v62 = vsub.f32 %v1785_v59, %v553_v60  ;;  %v1889_v0 = vsub.f32 %v1787_v61, %v553_v60 }
 0x1b0   :  { %v504_v1 = vpop.xlane.xlu0 %503 }
 0x1b1   :  { %v554_v3 = vmul.f32 0.0051020407, %v504_v1  ;;  %v595_v4 = vmul.f32 %v1886_v62, %v1886_v62  ;;  %v596_v7 = vmul.f32 %v1889_v0, %v1889_v0 }
 0x1b3   :  { %v1896_v8 = vsub.f32 %v1791_v2, %v554_v3  ;;  %v1899_v11 = vsub.f32 %v1794_v5, %v554_v3  ;;  %v623_v59 = vsel %vm496_vm0, %v596_v7, 0.0 }
 0x1b4   :  { %v508_v12 = vpop.xlane.xlu1 %507  ;;  %v624_v14 = vadd.f32 %v623_v59, %v595_v4 }
 0x1b5   :  { %v555_v61 = vmul.f32 0.0051020407, %v508_v12  ;;  %v597_v15 = vmul.f32 %v1896_v8, %v1896_v8  ;;  %v598_v17 = vmul.f32 %v1899_v11, %v1899_v11 }
 0x1b6   :  { %625 = vadd.xlane.f32.xlu0 %v624_v14 }
 0x1b7   :  { %v1907_v19 = vsub.f32 %v1798_v10, %v555_v61  ;;  %v1910_v2 = vsub.f32 %v1801_v13, %v555_v61  ;;  %v627_v5 = vsel %vm496_vm0, %v598_v17, 0.0 }
 0x1b8   :  { %v512_v22 = vpop.xlane.xlu1 %511  ;;  %v628_v23 = vadd.f32 %v627_v5, %v597_v15 }
 0x1b9   :  { %v556_v24 = vmul.f32 0.0051020407, %v512_v22  ;;  %v599_v25 = vmul.f32 %v1907_v19, %v1907_v19  ;;  %v600_v28 = vmul.f32 %v1910_v2, %v1910_v2 }
 0x1ba   :  { %629 = vadd.xlane.f32.xlu1 %v628_v23 }
 0x1bb   :  { %v1918_v30 = vsub.f32 %v1805_v18, %v556_v24  ;;  %v1921_v10 = vsub.f32 %v1808_v21, %v556_v24  ;;  %v631_v13 = vsel %vm496_vm0, %v600_v28, 0.0 }
 0x1bc   :  { %v516_v32 = vpop.xlane.xlu0 %515  ;;  %v632_v33 = vadd.f32 %v631_v13, %v599_v25 }
 0x1bd   :  { %v557_v35 = vmul.f32 0.0051020407, %v516_v32  ;;  %v601_v36 = vmul.f32 %v1918_v30, %v1918_v30  ;;  %v602_v39 = vmul.f32 %v1921_v10, %v1921_v10 }
 0x1be   :  { %633 = vadd.xlane.f32.xlu0 %v632_v33 }
 0x1bf   :  { %v1929_v40 = vsub.f32 %v1812_v26, %v557_v35  ;;  %v1932_v18 = vsub.f32 %v1815_v29, %v557_v35  ;;  %v635_v21 = vsel %vm496_vm0, %v602_v39, 0.0 }
 0x1c0   :  { %v520_v43 = vpop.xlane.xlu1 %519  ;;  %v636_v44 = vadd.f32 %v635_v21, %v601_v36 }
 0x1c1   :  { %v558_v46 = vmul.f32 0.0051020407, %v520_v43  ;;  %v603_v47 = vmul.f32 %v1929_v40, %v1929_v40  ;;  %v604_v49 = vmul.f32 %v1932_v18, %v1932_v18 }
 0x1c2   :  { %637 = vadd.xlane.f32.xlu1 %v636_v44 }
 0x1c3   :  { %v1940_v51 = vsub.f32 %v1819_v34, %v558_v46  ;;  %v1943_v26 = vsub.f32 %v1822_v37, %v558_v46  ;;  %v639_v29 = vsel %vm496_vm0, %v604_v49, 0.0 }
 0x1c4   :  { %v524_v54 = vpop.xlane.xlu0 %523  ;;  %v640_v55 = vadd.f32 %v639_v29, %v603_v47 }
 0x1c5   :  { %v559_v57 = vmul.f32 0.0051020407, %v524_v54  ;;  %v605_v60 = vmul.f32 %v1940_v51, %v1940_v51  ;;  %v606_v1 = vmul.f32 %v1943_v26, %v1943_v26 }
 0x1c6   :  { %641 = vadd.xlane.f32.xlu0 %v640_v55 }
 0x1c7   :  { %v1951_v3 = vsub.f32 %v1826_v42, %v559_v57  ;;  %v1954_v34 = vsub.f32 %v1829_v45, %v559_v57  ;;  %v643_v37 = vsel %vm496_vm0, %v606_v1, 0.0 }
 0x1c8   :  { %v528_v4 = vpop.xlane.xlu1 %527  ;;  %v644_v7 = vadd.f32 %v643_v37, %v605_v60 }
 0x1c9   :  { %v560_v59 = vmul.f32 0.0051020407, %v528_v4  ;;  %v607_v12 = vmul.f32 %v1951_v3, %v1951_v3  ;;  %v608_v14 = vmul.f32 %v1954_v34, %v1954_v34 }
 0x1ca   :  { %645 = vadd.xlane.f32.xlu1 %v644_v7 }
 0x1cb   :  { %v1962_v61 = vsub.f32 %v1833_v50, %v560_v59  ;;  %v1965_v42 = vsub.f32 %v1836_v53, %v560_v59  ;;  %v647_v45 = vsel %vm496_vm0, %v608_v14, 0.0 }
 0x1cc   :  { %v532_v15 = vpop.xlane.xlu0 %531  ;;  %v648_v17 = vadd.f32 %v647_v45, %v607_v12 }
 0x1cd   :  { %v561_v5 = vmul.f32 0.0051020407, %v532_v15  ;;  %v609_v22 = vmul.f32 %v1962_v61, %v1962_v61  ;;  %v610_v23 = vmul.f32 %v1965_v42, %v1965_v42 }
 0x1ce   :  { %649 = vadd.xlane.f32.xlu0 %v648_v17 }
 0x1cf   :  { %v1973_v24 = vsub.f32 %v1840_v58, %v561_v5  ;;  %v1976_v50 = vsub.f32 %v1843_v63, %v561_v5  ;;  %v651_v53 = vsel %vm496_vm0, %v610_v23, 0.0  ;;  %v708_v5 = vld [vmem:[%s2271_s2 + $0x8] sm:$0xff]  ;;  %v2049_v23 = vld [vmem:[%s2271_s2 + $0x30] sm:$0xff] }
 0x1d0   :  { %v536_v25 = vpop.xlane.xlu1 %535  ;;  %v652_v28 = vadd.f32 %v651_v53, %v609_v22  ;;  %v2043_v22 = vld [vmem:[%s2271_s2 + $0x20] sm:$0xff] }
 0x1d1   :  { %v562_v13 = vmul.f32 0.0051020407, %v536_v25  ;;  %v611_v32 = vmul.f32 %v1973_v24, %v1973_v24  ;;  %v612_v33 = vmul.f32 %v1976_v50, %v1976_v50  ;;  %v2055_v53 = vld [vmem:[%s2271_s2 + $0x40] sm:$0xff] }
 0x1d2   :  { %653 = vadd.xlane.f32.xlu1 %v652_v28  ;;  %v2061_v28 = vld [vmem:[%s2271_s2 + $0x50] sm:$0xff] }
 0x1d3   :  { %v1984_v35 = vsub.f32 %v1847_v6, %v562_v13  ;;  %v1987_v58 = vsub.f32 %v1850_v9, %v562_v13  ;;  %v655_v63 = vsel %vm496_vm0, %v612_v33, 0.0  ;;  %v1212_v33 = vmov 0  }
 0x1d4   :  { %v540_v36 = vpop.xlane.xlu0 %539  ;;  %v656_v39 = vadd.f32 %v655_v63, %v611_v32 }
 0x1d5   :  { %v563_v21 = vmul.f32 0.0051020407, %v540_v36  ;;  %v613_v43 = vmul.f32 %v1984_v35, %v1984_v35  ;;  %v614_v44 = vmul.f32 %v1987_v58, %v1987_v58 }
 0x1d6   :  { %657 = vadd.xlane.f32.xlu0 %v656_v39 }
 0x1d7   :  { %v1995_v46 = vsub.f32 %v1854_v16, %v563_v21  ;;  %v1998_v6 = vsub.f32 %v1857_v20, %v563_v21  ;;  %v659_v9 = vsel %vm496_vm0, %v614_v44, 0.0  ;;  %v2087_v44 = vld [vmem:[%s2271_s2 + $0x38] sm:$0xff] }
 0x1d8   :  { %v544_v47 = vpop.xlane.xlu1 %543  ;;  %v660_v49 = vadd.f32 %v659_v9, %v613_v43  ;;  %v2093_v9 = vld [vmem:[%s2271_s2 + $0x48] sm:$0xff] }
 0x1d9   :  { %v564_v29 = vmul.f32 0.0051020407, %v544_v47  ;;  %v615_v54 = vmul.f32 %v1995_v46, %v1995_v46  ;;  %v616_v55 = vmul.f32 %v1998_v6, %v1998_v6  ;;  %v2099_v47 = vld [vmem:[%s2271_s2 + $0x58] sm:$0xff] }
 0x1da   :  { %661 = vadd.xlane.f32.xlu1 %v660_v49 }
 0x1db   :  { %v2006_v57 = vsub.f32 %v1861_v27, %v564_v29  ;;  %v2009_v16 = vsub.f32 %v1864_v31, %v564_v29  ;;  %v663_v20 = vsel %vm496_vm0, %v616_v55, 0.0 }
 0x1dc   :  { %v548_v60 = vpop.xlane.xlu0 %547  ;;  %v664_v1 = vadd.f32 %v663_v20, %v615_v54 }
 0x1dd   :  { %v565_v37 = vmul.f32 0.0051020407, %v548_v60  ;;  %v617_v4 = vmul.f32 %v2006_v57, %v2006_v57  ;;  %v618_v7 = vmul.f32 %v2009_v16, %v2009_v16 }
 0x1de   :  { %665 = vadd.xlane.f32.xlu0 %v664_v1 }
 0x1df   :  { %v2017_v59 = vsub.f32 %v1868_v38, %v565_v37  ;;  %v2020_v27 = vsub.f32 %v1871_v41, %v565_v37  ;;  %v667_v31 = vsel %vm496_vm0, %v618_v7, 0.0  ;;  %v707_v38 = vld [vmem:[%s2271_s2] sm:$0xff]  ;;  %v2034_v41 = vld [vmem:[%s2271_s2 + $0x10] sm:$0xff] }
 0x1e0   :  { %v668_v12 = vadd.f32 %v667_v31, %v617_v4  ;;  %v552_v25 = vpop.xlane.xlu1 %551 }
 0x1e1   :  { %v619_v14 = vmul.f32 %v2017_v59, %v2017_v59  ;;  %v620_v45 = vmul.f32 %v2020_v27, %v2020_v27  ;;  %v566_v13 = vmul.f32 0.0051020407, %v552_v25 }
 0x1e2   :  { %669 = vadd.xlane.f32.xlu1 %v668_v12 }
 0x1e3   :  { %v671_v15 = vsel %vm496_vm0, %v620_v45, 0.0  ;;  %v2065_v32 = vsub.f32 %v1878_v52, %v566_v13  ;;  %v2068_v63 = vsub.f32 %v1875_v48, %v566_v13  ;;  %v710_v52 = vld [vmem:[%s2271_s2 + $0x18] sm:$0xff]  ;;  %v2081_v48 = vld [vmem:[%s2271_s2 + $0x28] sm:$0xff] }
 0x1e4   :  { %v672_v17 = vadd.f32 %v671_v15, %v619_v14 }
 0x1e5   :  { %v622_v36 = vmul.f32 %v2065_v32, %v2065_v32  ;;  %v621_v39 = vmul.f32 %v2068_v63, %v2068_v63 }
 0x1e6   :  { %673 = vadd.xlane.f32.xlu0 %v672_v17 }
 0x1e7   :  { %v675_v21 = vsel %vm496_vm0, %v622_v36, 0.0 }
 0x1e8   :  { %v676_v43 = vadd.f32 %v675_v21, %v621_v39 }
 0x1f3   :  { %863 = vperm.xlu1 %1177, %v707_v38  }
 0x1f7   :  { %873 = vperm.xlu1 %1177, %v2034_v41  }
 0x1fc   :  { %868 = vperm.xlu0 %1178, %v708_v5  }
 0x200   :  { %883 = vperm.xlu0 %1178, %v2043_v22  }
 0x204   :  { %893 = vperm.xlu0 %1178, %v2049_v23  }
 0x208   :  { %903 = vperm.xlu0 %1178, %v2055_v53  }
 0x20c   :  { %913 = vperm.xlu0 %1178, %v2061_v28  }
 0x210   :  { %1179 = vset.pattern.permute.xlu0 %v1212_v33 }
 0x21b   :  { %677 = vadd.xlane.f32.xlu1 %v676_v43 }
 0x22c   :  { %878 = vperm.xlu1 %1177, %v710_v52  }
 0x230   :  { %888 = vperm.xlu1 %1177, %v2081_v48  }
 0x234   :  { %898 = vperm.xlu1 %1177, %v2087_v44  }
 0x238   :  { %908 = vperm.xlu1 %1177, %v2093_v9  }
 0x23c   :  { %918 = vperm.xlu1 %1177, %v2099_v47  }
 0x240   :  { %1180 = vset.pattern.permute.xlu1 %v1212_v33 }
 0x243   :  { %v626_v49 = vpop.xlane.xlu0 %625 }
 0x244   :  { %v679_v29 = vmul.f32 0.0051020407, %v626_v49 }
 0x246   :  { %v693_v54 = vmax.f32 %v679_v29, 0.0 }
 0x247   :  { %v630_v55 = vpop.xlane.xlu1 %629 }
 0x248   :  { %v721_v20 = vadd.f32 0.001, %v693_v54  ;;  %v680_v60 = vmul.f32 0.0051020407, %v630_v55 }
 0x24a   :  { %1183 = vrsqrt.f32 %v721_v20  ;;  %v694_v1 = vmax.f32 %v680_v60, 0.0 }
 0x24b   :  { %v634_v37 = vpop.xlane.xlu0 %633 }
 0x24c   :  { %v722_v4 = vadd.f32 0.001, %v694_v1  ;;  %v681_v7 = vmul.f32 0.0051020407, %v634_v37 }
 0x24e   :  { %1185 = vrsqrt.f32 %v722_v4  ;;  %v695_v31 = vmax.f32 %v681_v7, 0.0 }
 0x24f   :  { %v638_v12 = vpop.xlane.xlu1 %637 }
 0x250   :  { %v723_v14 = vadd.f32 0.001, %v695_v31  ;;  %v682_v45 = vmul.f32 0.0051020407, %v638_v12 }
 0x252   :  { %1187 = vrsqrt.f32 %v723_v14  ;;  %v696_v15 = vmax.f32 %v682_v45, 0.0 }
 0x253   :  { %v642_v17 = vpop.xlane.xlu0 %641 }
 0x254   :  { %v1184_v25 = vpop.eup %1183  ;;  %v724_v13 = vadd.f32 0.001, %v696_v15  ;;  %v683_v33 = vmul.f32 0.0051020407, %v642_v17 }
 0x255   :  { %v749_v36 = vmul.f32 %v1184_v25, %v707_v38 }
 0x256   :  { %1189 = vrsqrt.f32 %v724_v13  ;;  %v697_v39 = vmax.f32 %v683_v33, 0.0 }
 0x257   :  { %765 = vperm.xlu0 %1179, %v749_v36   ;;  %v646_v21 = vpop.xlane.xlu1 %645 }
 0x258   :  { %v1186_v43 = vpop.eup %1185  ;;  %v725_v49 = vadd.f32 0.001, %v697_v39  ;;  %v684_v29 = vmul.f32 0.0051020407, %v646_v21 }
 0x259   :  { %v750_v54 = vmul.f32 %v1186_v43, %v708_v5 }
 0x25a   :  { %1191 = vrsqrt.f32 %v725_v49  ;;  %v698_v55 = vmax.f32 %v684_v29, 0.0 }
 0x25b   :  { %v650_v20 = vpop.xlane.xlu0 %649  ;;  %770 = vperm.xlu1 %1180, %v750_v54  }
 0x25c   :  { %v1188_v60 = vpop.eup %1187  ;;  %v726_v1 = vadd.f32 0.001, %v698_v55  ;;  %v685_v37 = vmul.f32 0.0051020407, %v650_v20 }
 0x25d   :  { %v751_v4 = vmul.f32 %v1188_v60, %v2034_v41 }
 0x25e   :  { %1193 = vrsqrt.f32 %v726_v1  ;;  %v699_v7 = vmax.f32 %v685_v37, 0.0 }
 0x25f   :  { %775 = vperm.xlu1 %1180, %v751_v4   ;;  %v654_v38 = vpop.xlane.xlu1 %653 }
 0x260   :  { %v1190_v31 = vpop.eup %1189  ;;  %v727_v12 = vadd.f32 0.001, %v699_v7  ;;  %v686_v14 = vmul.f32 0.0051020407, %v654_v38 }
 0x261   :  { %v752_v45 = vmul.f32 %v1190_v31, %v710_v52 }
 0x262   :  { %1195 = vrsqrt.f32 %v727_v12  ;;  %v700_v15 = vmax.f32 %v686_v14, 0.0 }
 0x263   :  { %v658_v5 = vpop.xlane.xlu0 %657  ;;  %780 = vperm.xlu1 %1180, %v752_v45  }
 0x264   :  { %v1192_v17 = vpop.eup %1191  ;;  %v728_v25 = vadd.f32 0.001, %v700_v15  ;;  %v687_v13 = vmul.f32 0.0051020407, %v658_v5 }
 0x265   :  { %v753_v33 = vmul.f32 %v1192_v17, %v2043_v22 }
 0x266   :  { %1197 = vrsqrt.f32 %v728_v25  ;;  %v701_v36 = vmax.f32 %v687_v13, 0.0 }
 0x267   :  { %785 = vperm.xlu1 %1180, %v753_v33   ;;  %v662_v41 = vpop.xlane.xlu1 %661 }
 0x268   :  { %v1194_v39 = vpop.eup %1193  ;;  %v729_v21 = vadd.f32 0.001, %v701_v36  ;;  %v688_v43 = vmul.f32 0.0051020407, %v662_v41 }
 0x269   :  { %v754_v49 = vmul.f32 %v1194_v39, %v2081_v48 }
 0x26a   :  { %1199 = vrsqrt.f32 %v729_v21  ;;  %v702_v52 = vmax.f32 %v688_v43, 0.0 }
 0x26b   :  { %v666_v29 = vpop.xlane.xlu0 %665  ;;  %790 = vperm.xlu1 %1180, %v754_v49  }
 0x26c   :  { %v1196_v54 = vpop.eup %1195  ;;  %v730_v55 = vadd.f32 0.001, %v702_v52  ;;  %v689_v20 = vmul.f32 0.0051020407, %v666_v29 }
 0x26d   :  { %v755_v60 = vmul.f32 %v1196_v54, %v2049_v23 }
 0x26e   :  { %1201 = vrsqrt.f32 %v730_v55  ;;  %v703_v22 = vmax.f32 %v689_v20, 0.0 }
 0x26f   :  { %795 = vperm.xlu1 %1180, %v755_v60   ;;  %v670_v1 = vpop.xlane.xlu1 %669 }
 0x270   :  { %v1198_v37 = vpop.eup %1197  ;;  %v731_v4 = vadd.f32 0.001, %v703_v22  ;;  %v690_v7 = vmul.f32 0.0051020407, %v670_v1 }
 0x271   :  { %v756_v38 = vmul.f32 %v1198_v37, %v2087_v44 }
 0x272   :  { %1203 = vrsqrt.f32 %v731_v4  ;;  %v704_v48 = vmax.f32 %v690_v7, 0.0 }
 0x273   :  { %v674_v31 = vpop.xlane.xlu0 %673  ;;  %800 = vperm.xlu1 %1180, %v756_v38  }
 0x274   :  { %v1200_v12 = vpop.eup %1199  ;;  %v732_v14 = vadd.f32 0.001, %v704_v48  ;;  %v691_v45 = vmul.f32 0.0051020407, %v674_v31 }
 0x275   :  { %v757_v15 = vmul.f32 %v1200_v12, %v2055_v53  ;;  %v719_v53 = vld [vmem:[%s2271_s2 + $0x60] sm:$0xff] }
 0x276   :  { %1205 = vrsqrt.f32 %v732_v14  ;;  %v705_v23 = vmax.f32 %v691_v45, 0.0 }
 0x277   :  { %805 = vperm.xlu1 %1180, %v757_v15  }
 0x278   :  { %v1202_v5 = vpop.eup %1201  ;;  %v733_v17 = vadd.f32 0.001, %v705_v23 }
 0x279   :  { %v758_v25 = vmul.f32 %v1202_v5, %v2093_v9  ;;  %v720_v9 = vld [vmem:[%s2271_s2 + $0x68] sm:$0xff] }
 0x27a   :  { %1207 = vrsqrt.f32 %v733_v17 }
 0x27b   :  { %810 = vperm.xlu0 %1179, %v758_v25   ;;  %v869_v29 = vpop.permute.xlu0 %868 }
 0x27c   :  { %v1204_v13 = vpop.eup %1203 }
 0x27d   :  { %v759_v44 = vmul.f32 %v1204_v13, %v2061_v28  ;;  %v864_v28 = vpop.permute.xlu1 %863 }
 0x27f   :  { %815 = vperm.xlu1 %1180, %v759_v44   ;;  %v884_v60 = vpop.permute.xlu0 %883 }
 0x280   :  { %v1206_v33 = vpop.eup %1205 }
 0x281   :  { %v760_v36 = vmul.f32 %v1206_v33, %v2099_v47  ;;  %v874_v21 = vpop.permute.xlu1 %873 }
 0x283   :  { %820 = vperm.xlu0 %1179, %v760_v36   ;;  %v2119_v1 = vpop.permute.xlu0 %893 }
 0x284   :  { %v1208_v41 = vpop.eup %1207 }
 0x285   :  { %v761_v39 = vmul.f32 %v1208_v41, %v719_v53 }
 0x287   :  { %825 = vperm.xlu1 %1180, %v761_v39   ;;  %v2123_v4 = vpop.permute.xlu0 %903 }
 0x28b   :  { %1182 = vset.pattern.permute.xlu1 %v1211_v56  ;;  %v2127_v38 = vpop.permute.xlu0 %913 }
 0x28c   :  { %928 = vperm.xlu1 %1182, %v720_v9  }
 0x2a8   :  { %v678_v43 = vpop.xlane.xlu1 %677 }
 0x2a9   :  { %v692_v49 = vmul.f32 0.0051020407, %v678_v43 }
 0x2ab   :  { %v706_v47 = vmax.f32 %v692_v49, 0.0 }
 0x2ac   :  { %v879_v20 = vpop.permute.xlu1 %878 }
 0x2ad   :  { %v734_v52 = vadd.f32 0.001, %v706_v47 }
 0x2af   :  { %1209 = vrsqrt.f32 %v734_v52 }
 0x2b0   :  { %v889_v22 = vpop.permute.xlu1 %888 }
 0x2b4   :  { %v2121_v37 = vpop.permute.xlu1 %898 }
 0x2b8   :  { %v2125_v7 = vpop.permute.xlu1 %908 }
 0x2b9   :  { %v1210_v54 = vpop.eup %1209 }
 0x2ba   :  { %v762_v55 = vmul.f32 %v1210_v54, %v720_v9 }
 0x2bc   :  { %830 = vperm.xlu0 %1179, %v762_v55   ;;  %v2129_v48 = vpop.permute.xlu1 %918 }
 0x2c0   :  { %1181 = vset.pattern.permute.xlu0 %v1211_v56 }
 0x2c1   :  { %923 = vperm.xlu0 %1181, %v719_v53  }
 0x2d6   :  { %v766_v31 = vpop.permute.xlu0 %765 }
 0x2d7   :  { %v833_v12 = vmul.f32 %v766_v31, %v1886_v62  ;;  %v834_v14 = vmul.f32 %v766_v31, %v1889_v0 }
 0x2d9   :  { %v931_v56 = vadd.f32 %v864_v28, %v833_v12  ;;  %v932_v45 = vadd.f32 %v864_v28, %v834_v14 }
 0x2da   :  { %v771_v15 = vpop.permute.xlu1 %770 }
 0x2db   :  { %v959_v23 = vmax.f32 %v931_v56, 0.0  ;;  %v960_v5 = vmax.f32 %v932_v45, 0.0  ;;  %v835_v17 = vmul.f32 %v771_v15, %v1896_v8  ;;  %v836_v25 = vmul.f32 %v771_v15, %v1899_v11 }
 0x2dd   :  { %987 = vst [vmem:[%s2272_s3] sm:$0xff] %v959_v23  ;;  %988 = vst.msk [vmem:[%s2272_s3 + $0x8] sm:$0xff] %vm496_vm0, %v960_v5  ;;  %v933_v62 = vadd.f32 %v869_v29, %v835_v17  ;;  %v934_v0 = vadd.f32 %v869_v29, %v836_v25 }
 0x2de   :  { %v776_v13 = vpop.permute.xlu1 %775 }
 0x2df   :  { %v961_v44 = vmax.f32 %v933_v62, 0.0  ;;  %v962_v33 = vmax.f32 %v934_v0, 0.0  ;;  %v837_v36 = vmul.f32 %v776_v13, %v1907_v19  ;;  %v838_v8 = vmul.f32 %v776_v13, %v1910_v2 }
 0x2e1   :  { %989 = vst [vmem:[%s2272_s3 + $0x10] sm:$0xff] %v961_v44  ;;  %990 = vst.msk [vmem:[%s2272_s3 + $0x18] sm:$0xff] %vm496_vm0, %v962_v33  ;;  %v935_v11 = vadd.f32 %v874_v21, %v837_v36  ;;  %v936_v53 = vadd.f32 %v874_v21, %v838_v8 }
 0x2e2   :  { %v781_v41 = vpop.permute.xlu1 %780 }
 0x2e3   :  { %v963_v39 = vmax.f32 %v935_v11, 0.0  ;;  %v964_v9 = vmax.f32 %v936_v53, 0.0  ;;  %v839_v28 = vmul.f32 %v781_v41, %v1918_v30  ;;  %v840_v19 = vmul.f32 %v781_v41, %v1921_v10 }
 0x2e5   :  { %991 = vst [vmem:[%s2272_s3 + $0x20] sm:$0xff] %v963_v39  ;;  %992 = vst.msk [vmem:[%s2272_s3 + $0x28] sm:$0xff] %vm496_vm0, %v964_v9  ;;  %v937_v2 = vadd.f32 %v879_v20, %v839_v28  ;;  %v938_v43 = vadd.f32 %v879_v20, %v840_v19 }
 0x2e6   :  { %v786_v49 = vpop.permute.xlu1 %785 }
 0x2e7   :  { %v965_v21 = vmax.f32 %v937_v2, 0.0  ;;  %v966_v47 = vmax.f32 %v938_v43, 0.0  ;;  %v841_v52 = vmul.f32 %v786_v49, %v1929_v40  ;;  %v842_v30 = vmul.f32 %v786_v49, %v1932_v18 }
 0x2e9   :  { %993 = vst [vmem:[%s2272_s3 + $0x30] sm:$0xff] %v965_v21  ;;  %994 = vst.msk [vmem:[%s2272_s3 + $0x38] sm:$0xff] %vm496_vm0, %v966_v47  ;;  %v939_v10 = vadd.f32 %v884_v60, %v841_v52  ;;  %v940_v29 = vadd.f32 %v884_v60, %v842_v30 }
 0x2ea   :  { %v791_v54 = vpop.permute.xlu1 %790 }
 0x2eb   :  { %v967_v55 = vmax.f32 %v939_v10, 0.0  ;;  %v968_v20 = vmax.f32 %v940_v29, 0.0  ;;  %v843_v31 = vmul.f32 %v791_v54, %v1940_v51  ;;  %v844_v40 = vmul.f32 %v791_v54, %v1943_v26 }
 0x2ed   :  { %995 = vst [vmem:[%s2272_s3 + $0x40] sm:$0xff] %v967_v55  ;;  %996 = vst.msk [vmem:[%s2272_s3 + $0x48] sm:$0xff] %vm496_vm0, %v968_v20  ;;  %v941_v18 = vadd.f32 %v889_v22, %v843_v31  ;;  %v942_v12 = vadd.f32 %v889_v22, %v844_v40 }
 0x2ee   :  { %v796_v14 = vpop.permute.xlu1 %795 }
 0x2ef   :  { %v969_v60 = vmax.f32 %v941_v18, 0.0  ;;  %v970_v56 = vmax.f32 %v942_v12, 0.0  ;;  %v845_v45 = vmul.f32 %v796_v14, %v1951_v3  ;;  %v846_v51 = vmul.f32 %v796_v14, %v1954_v34 }
 0x2f1   :  { %997 = vst [vmem:[%s2272_s3 + $0x50] sm:$0xff] %v969_v60  ;;  %998 = vst.msk [vmem:[%s2272_s3 + $0x58] sm:$0xff] %vm496_vm0, %v970_v56  ;;  %v943_v26 = vadd.f32 %v2119_v1, %v845_v45  ;;  %v944_v22 = vadd.f32 %v2119_v1, %v846_v51 }
 0x2f2   :  { %v801_v15 = vpop.permute.xlu1 %800 }
 0x2f3   :  { %v971_v23 = vmax.f32 %v943_v26, 0.0  ;;  %v972_v5 = vmax.f32 %v944_v22, 0.0  ;;  %v847_v3 = vmul.f32 %v801_v15, %v1962_v61  ;;  %v848_v34 = vmul.f32 %v801_v15, %v1965_v42 }
 0x2f5   :  { %999 = vst [vmem:[%s2272_s3 + $0x60] sm:$0xff] %v971_v23  ;;  %1000 = vst.msk [vmem:[%s2272_s3 + $0x68] sm:$0xff] %vm496_vm0, %v972_v5  ;;  %v945_v17 = vadd.f32 %v2121_v37, %v847_v3  ;;  %v946_v1 = vadd.f32 %v2121_v37, %v848_v34 }
 0x2f6   :  { %v806_v25 = vpop.permute.xlu1 %805 }
 0x2f7   :  { %v973_v62 = vmax.f32 %v945_v17, 0.0  ;;  %v974_v0 = vmax.f32 %v946_v1, 0.0  ;;  %v849_v61 = vmul.f32 %v806_v25, %v1973_v24  ;;  %v850_v42 = vmul.f32 %v806_v25, %v1976_v50 }
 0x2f9   :  { %1001 = vst [vmem:[%s2272_s3 + $0x70] sm:$0xff] %v973_v62  ;;  %1002 = vst.msk [vmem:[%s2272_s3 + $0x78] sm:$0xff] %vm496_vm0, %v974_v0  ;;  %v947_v13 = vadd.f32 %v2123_v4, %v849_v61  ;;  %v948_v37 = vadd.f32 %v2123_v4, %v850_v42 }
 0x2fa   :  { %v811_v44 = vpop.permute.xlu0 %810 }
 0x2fb   :  { %v975_v33 = vmax.f32 %v947_v13, 0.0  ;;  %v976_v36 = vmax.f32 %v948_v37, 0.0  ;;  %v851_v24 = vmul.f32 %v811_v44, %v1984_v35  ;;  %v852_v50 = vmul.f32 %v811_v44, %v1987_v58 }
 0x2fd   :  { %1003 = vst [vmem:[%s2272_s3 + $0x80] sm:$0xff] %v975_v33  ;;  %1004 = vst.msk [vmem:[%s2272_s3 + $0x88] sm:$0xff] %vm496_vm0, %v976_v36  ;;  %v949_v8 = vadd.f32 %v2125_v7, %v851_v24  ;;  %v950_v4 = vadd.f32 %v2125_v7, %v852_v50 }
 0x2fe   :  { %v816_v11 = vpop.permute.xlu1 %815 }
 0x2ff   :  { %v977_v53 = vmax.f32 %v949_v8, 0.0  ;;  %v978_v41 = vmax.f32 %v950_v4, 0.0  ;;  %v853_v35 = vmul.f32 %v816_v11, %v1995_v46  ;;  %v854_v58 = vmul.f32 %v816_v11, %v1998_v6 }
 0x301   :  { %1005 = vst [vmem:[%s2272_s3 + $0x90] sm:$0xff] %v977_v53  ;;  %1006 = vst.msk [vmem:[%s2272_s3 + $0x98] sm:$0xff] %vm496_vm0, %v978_v41  ;;  %v951_v39 = vadd.f32 %v2127_v38, %v853_v35  ;;  %v952_v7 = vadd.f32 %v2127_v38, %v854_v58 }
 0x302   :  { %v821_v9 = vpop.permute.xlu0 %820 }
 0x303   :  { %v979_v28 = vmax.f32 %v951_v39, 0.0  ;;  %v980_v19 = vmax.f32 %v952_v7, 0.0  ;;  %v855_v46 = vmul.f32 %v821_v9, %v2006_v57  ;;  %v856_v6 = vmul.f32 %v821_v9, %v2009_v16 }
 0x305   :  { %1007 = vst [vmem:[%s2272_s3 + $0xa0] sm:$0xff] %v979_v28  ;;  %1008 = vst.msk [vmem:[%s2272_s3 + $0xa8] sm:$0xff] %vm496_vm0, %v980_v19  ;;  %v953_v2 = vadd.f32 %v2129_v48, %v855_v46  ;;  %v954_v38 = vadd.f32 %v2129_v48, %v856_v6 }
 0x306   :  { %v826_v57 = vpop.permute.xlu1 %825 }
 0x307   :  { %v981_v43 = vmax.f32 %v953_v2, 0.0  ;;  %v982_v49 = vmax.f32 %v954_v38, 0.0  ;;  %v857_v10 = vmul.f32 %v826_v57, %v2017_v59  ;;  %v858_v29 = vmul.f32 %v826_v57, %v2020_v27 }
 0x309   :  { %1009 = vst [vmem:[%s2272_s3 + $0xb0] sm:$0xff] %v981_v43  ;;  %1010 = vst.msk [vmem:[%s2272_s3 + $0xb8] sm:$0xff] %vm496_vm0, %v982_v49 }
 0x30b   :  { %v929_v21 = vpop.permute.xlu1 %928 }
 0x33b   :  { %v831_v16 = vpop.permute.xlu0 %830 }
 0x33c   :  { %v859_v47 = vmul.f32 %v831_v16, %v2068_v63  ;;  %v860_v52 = vmul.f32 %v831_v16, %v2065_v32 }
 0x33e   :  { %v957_v30 = vadd.f32 %v929_v21, %v859_v47  ;;  %v958_v48 = vadd.f32 %v929_v21, %v860_v52 }
 0x340   :  { %v985_v54 = vmax.f32 %v957_v30, 0.0  ;;  %v986_v55 = vmax.f32 %v958_v48, 0.0  ;;  %v924_v20 = vpop.permute.xlu0 %923 }
 0x341   :  { %v955_v31 = vadd.f32 %v924_v20, %v857_v10  ;;  %v956_v40 = vadd.f32 %v924_v20, %v858_v29 }
 0x342   :  { %1013 = vst [vmem:[%s2272_s3 + $0xd0] sm:$0xff] %v985_v54  ;;  %1014 = vst.msk [vmem:[%s2272_s3 + $0xd8] sm:$0xff] %vm496_vm0, %v986_v55 }
 0x343   :  { %v983_v32 = vmax.f32 %v955_v31, 0.0  ;;  %v984_v63 = vmax.f32 %v956_v40, 0.0 }
 0x345   :  { %1011 = vst [vmem:[%s2272_s3 + $0xc0] sm:$0xff] %v983_v32  ;;  %1012 = vst.msk [vmem:[%s2272_s3 + $0xc8] sm:$0xff] %vm496_vm0, %v984_v63 }

</bundles_post_ra>
